<compile_context>
chip_gen: v7x
topology: tpu7x:2x2x1
jax: 0.10.0
libtpu: 0.0.40
codegen_flags: <defaults>
</compile_context>

<pallas_src>
import jax
import jax.numpy as jnp
from jax.experimental import pallas as pl
from jax.experimental.pallas import tpu as pltpu

LANE = 128
SUBLANE = 8
LN_EPS = 1e-5


def _round_up(v, m):
    return (v + m - 1) // m * m


def make_fused_gcn_kernel(layer_meta, n_real):
    """Build a kernel computing the full GCN stack in one invocation.

    layer_meta: tuple of (din_pad, dout_pad, dout_real) per conv layer (static).
    n_real:     number of real (unpadded) nodes (static).
    """
    n_layers = len(layer_meta)

    def kernel(a_hbm_ref, x_ref, *rest):
        # rest = [5 refs per layer] + [o_ref] + [a_vmem, a_sem]
        o_ref = rest[5 * n_layers]
        a_vmem = rest[5 * n_layers + 1]
        a_sem = rest[5 * n_layers + 2]

        # Kick off the (dominant) adjacency HBM->VMEM DMA immediately; it overlaps
        # with the first layer's feature transform below.
        a_copy = pltpu.make_async_copy(a_hbm_ref, a_vmem, a_sem)
        a_copy.start()

        h = x_ref[...]                                   # [Np, dpad0] bf16
        np_ = h.shape[0]
        row_ids = jax.lax.broadcasted_iota(jnp.int32, (np_, 1), 0)
        row_mask = row_ids < n_real                      # thin [Np,1] mask, broadcasts

        a = None
        for li, (din_p, dout_p, dout_real) in enumerate(layer_meta):
            wt_ref, b_ref, g_ref, be_ref, al_ref = rest[5 * li: 5 * li + 5]
            w = wt_ref[...]                              # [din_p, dout_p] bf16 (W^T)

            # ---- GCNConv: A_hat @ (H W^T) + b (ordering by padded FLOPs) ----
            if li == 0:
                # Feature transform first so the MXU runs while A streams in.
                hw = jnp.dot(h, w, preferred_element_type=jnp.float32)
                a_copy.wait()
                a = a_vmem[...]                          # [Np, Np] bf16, resident
                conv = jnp.dot(a, hw.astype(jnp.bfloat16),
                               preferred_element_type=jnp.float32)
            elif din_p < dout_p:
                ah = jnp.dot(a, h, preferred_element_type=jnp.float32)
                conv = jnp.dot(ah.astype(jnp.bfloat16), w,
                               preferred_element_type=jnp.float32)
            else:
                hw = jnp.dot(h, w, preferred_element_type=jnp.float32)
                conv = jnp.dot(a, hw.astype(jnp.bfloat16),
                               preferred_element_type=jnp.float32)
            conv = conv + b_ref[...]                     # f32 [Np, dout_p]

            # ---- PyG LayerNorm mode='graph' (stats over real N x dout, f32) --
            # Padded columns of conv are exactly zero (zero-padded W^T / bias), so
            # only the row mask is needed.  One masked pass: var = E[x^2] - mean^2.
            masked = jnp.where(row_mask, conv, 0.0)
            cnt = jnp.float32(n_real * dout_real)
            mean = jnp.sum(masked) / cnt
            var = jnp.maximum(jnp.sum(masked * masked) / cnt - mean * mean, 0.0)
            inv = 1.0 / (jnp.sqrt(var) + LN_EPS)         # PyG: x / (std_biased + eps)
            g_scaled = g_ref[...] * inv                  # fold scalar into gamma (row op)
            b_adj = be_ref[...] - mean * g_scaled        # fold mean into beta   (row op)
            hn = conv * g_scaled + b_adj                 # single full-tile mul + add

            # ---- PReLU (single shared slope, scalar from SMEM) ---------------
            alpha = al_ref[0]
            act = jnp.where(hn > 0, hn, hn * alpha)

            if li + 1 < n_layers:
                h = act.astype(jnp.bfloat16)             # stays on-chip; next MXU input
            else:
                o_ref[...] = act                         # lane-dense f32 store

    return kernel


def build_normalized_adj(edge_index, n_nodes):
    """Glue: densify edge_index into A_hat = D^-1/2 (A + I) D^-1/2 (bf16 output).

    PyG convention: edge_index = [source; target], messages flow source -> target,
    so A[target, source] = 1; degrees from row sums after adding self-loops.
    """
    src, dst = edge_index[0], edge_index[1]
    a = jnp.zeros((n_nodes, n_nodes), jnp.float32)
    a = a.at[dst, src].add(1.0)
    a = a + jnp.eye(n_nodes, dtype=jnp.float32)
    deg = a.sum(axis=1)
    dinv = jnp.where(deg > 0, 1.0 / jnp.sqrt(deg), 0.0)
    # Cast to bf16 BEFORE padding so the padded N^2 copy is half the bytes.
    return (dinv[:, None] * a * dinv[None, :]).astype(jnp.bfloat16)


def gcn_forward(x, edge_index, params):
    """Full GCN forward: one fused Pallas kernel for all layers."""
    n, din0 = x.shape
    douts = [w.shape[0] for (w, _, _, _, _) in params]
    d_pads = [_round_up(din0, LANE)] + [_round_up(d, LANE) for d in douts]
    np_pad = _round_up(max(n, SUBLANE), SUBLANE)

    a_hat = build_normalized_adj(edge_index, n)
    a_p = jnp.pad(a_hat, ((0, np_pad - n), (0, np_pad - n)))        # bf16, zero-padded
    x_p = jnp.pad(x.astype(jnp.float32),
                  ((0, np_pad - n), (0, d_pads[0] - din0))).astype(jnp.bfloat16)

    flat_inputs = [a_p, x_p]
    in_specs = [
        pl.BlockSpec(memory_space=pl.ANY),                          # A stays in HBM
        pl.BlockSpec(memory_space=pltpu.MemorySpace.VMEM),          # single-buffered
    ]
    layer_meta = []
    flops = 0
    bytes_accessed = a_p.size * 2 + x_p.size * 2
    for li, (w, b, gamma, beta, alpha) in enumerate(params):
        dout, din = w.shape
        din_p, dout_p = d_pads[li], d_pads[li + 1]
        layer_meta.append((din_p, dout_p, dout))
        # NOTE: padded regions of W^T / bias / gamma / beta MUST stay zero (the
        # kernel's masking and padded-column invariants rely on it).
        wt = jnp.pad(w.T.astype(jnp.float32),
                     ((0, din_p - din), (0, dout_p - dout))).astype(jnp.bfloat16)
        b_p = jnp.pad(b.astype(jnp.float32).reshape(1, dout),
                      ((0, 0), (0, dout_p - dout)))
        g_p = jnp.pad(gamma.astype(jnp.float32).reshape(1, dout),
                      ((0, 0), (0, dout_p - dout)))
        be_p = jnp.pad(beta.astype(jnp.float32).reshape(1, dout),
                       ((0, 0), (0, dout_p - dout)))
        al_p = alpha.astype(jnp.float32).reshape((1,))
        flat_inputs += [wt, b_p, g_p, be_p, al_p]
        in_specs += [
            pl.BlockSpec(memory_space=pltpu.MemorySpace.VMEM),
            pl.BlockSpec(memory_space=pltpu.MemorySpace.VMEM),
            pl.BlockSpec(memory_space=pltpu.MemorySpace.VMEM),
            pl.BlockSpec(memory_space=pltpu.MemorySpace.VMEM),
            pl.BlockSpec(memory_space=pltpu.MemorySpace.SMEM),      # PReLU slope scalar
        ]
        flops += 2 * np_pad * np_pad * dout_p + 2 * np_pad * din_p * dout_p
        bytes_accessed += wt.size * 2 + (b_p.size + g_p.size + be_p.size) * 4

    out_dp = d_pads[-1]
    bytes_accessed += np_pad * out_dp * 4

    # VMEM footprint (no grid -> no pipeline double-buffering of any input).
    vmem_needed = (
        np_pad * np_pad * 2                                          # A scratch (bf16)
        + x_p.size * 2
        + sum(din_p * dout_p * 2 + 3 * dout_p * 4
              for din_p, dout_p, _ in layer_meta)
        + np_pad * out_dp * 4                                        # output buffer
        + 6 * np_pad * max(d_pads) * 4                               # f32 temporaries
    )
    vmem_limit = int(min(max(2 * vmem_needed, 32 << 20), 128 << 20))

    kernel = make_fused_gcn_kernel(tuple(layer_meta), n)
    out_p = pl.pallas_call(
        kernel,
        out_shape=jax.ShapeDtypeStruct((np_pad, out_dp), jnp.float32),
        in_specs=in_specs,
        out_specs=pl.BlockSpec(memory_space=pltpu.MemorySpace.VMEM),
        scratch_shapes=[
            pltpu.VMEM((np_pad, np_pad), jnp.bfloat16),              # resident A copy
            pltpu.SemaphoreType.DMA,
        ],
        compiler_params=pltpu.CompilerParams(vmem_limit_bytes=vmem_limit),
        cost_estimate=pl.CostEstimate(flops=int(flops), transcendentals=0,
                                      bytes_accessed=int(bytes_accessed)),
    )(*flat_inputs)
    return out_p[:n, :douts[-1]]


if __name__ == "__main__":
    key = jax.random.PRNGKey(0)
    N, E = 32, 64                      # nodes, edges
    layer_sizes = [16, 32, 32]         # GCN([16, 32, 32]) -> 2 conv layers

    k_x, k_e1, k_e2, k_p = jax.random.split(key, 4)
    x = jax.random.normal(k_x, (N, layer_sizes[0]), jnp.float32)

    # deterministic random edges, no self-loops
    src = jax.random.randint(k_e1, (E,), 0, N)
    dst = (src + 1 + jax.random.randint(k_e2, (E,), 0, N - 1)) % N
    edge_index = jnp.stack([src, dst]).astype(jnp.int32)

    # deterministic parameter init (synthetic; shapes follow the module's __init__)
    params = []
    pkey = k_p
    for din, dout in zip(layer_sizes[:-1], layer_sizes[1:]):
        pkey, kw = jax.random.split(pkey)
        w = jax.random.normal(kw, (dout, din), jnp.float32) / jnp.sqrt(jnp.float32(din))
        b = jnp.zeros((dout,), jnp.float32)          # GCNConv bias
        gamma = jnp.ones((dout,), jnp.float32)       # LayerNorm affine weight
        beta = jnp.zeros((dout,), jnp.float32)       # LayerNorm affine bias
        alpha = jnp.full((1,), 0.25, jnp.float32)    # PReLU slope
        params.append((w, b, gamma, beta, alpha))

    fwd = jax.jit(gcn_forward)
    out = fwd(x, edge_index, params)
    jax.block_until_ready(out)
    assert out.shape == (N, layer_sizes[-1])
    print("KERNEL_OK")
</pallas_src>

<mosaic_0001>
module attributes {stable_mosaic.version = 11 : i64} {
  func.func private @main(%arg0: i32) attributes {dimension_semantics = [#tpu.dimension_semantics<core_parallel>], iteration_bounds = array<i64: 2>, tpu.core_type = #tpu.core_type<sc_scalar_subcore>, window_params = []} {
    return
  }
}

module attributes {stable_mosaic.version = 11 : i64} {
  func.func private @main(%arg0: i32) attributes {dimension_semantics = [#tpu.dimension_semantics<core_parallel>], iteration_bounds = array<i64: 2>, tpu.core_type = #tpu.core_type<sc_scalar_subcore>, window_params = []} {
    return
  }
}

module attributes {stable_mosaic.version = 11 : i64} {
  func.func @kernel(%arg0: memref<32x32xbf16, #tpu.memory_space<any>>, %arg1: memref<32x128xbf16, #tpu.memory_space<vmem>>, %arg2: memref<128x128xbf16, #tpu.memory_space<vmem>>, %arg3: memref<1x128xf32, #tpu.memory_space<vmem>>, %arg4: memref<1x128xf32, #tpu.memory_space<vmem>>, %arg5: memref<1x128xf32, #tpu.memory_space<vmem>>, %arg6: memref<1xf32, #tpu.memory_space<smem>>, %arg7: memref<128x128xbf16, #tpu.memory_space<vmem>>, %arg8: memref<1x128xf32, #tpu.memory_space<vmem>>, %arg9: memref<1x128xf32, #tpu.memory_space<vmem>>, %arg10: memref<1x128xf32, #tpu.memory_space<vmem>>, %arg11: memref<1xf32, #tpu.memory_space<smem>>, %arg12: memref<32x128xf32, #tpu.memory_space<vmem>>, %arg13: memref<32x32xbf16, #tpu.memory_space<vmem>>, %arg14: memref<!tpu.dma_semaphore, #tpu.memory_space<semaphore_mem>>) attributes {dimension_semantics = [], scalar_prefetch = 0 : i64, scratch_operands = 2 : i64, tpu.core_type = #tpu.core_type<tc>} {
    tpu.enqueue_dma source(%arg0 : memref<32x32xbf16, #tpu.memory_space<any>>) target(%arg13 : memref<32x32xbf16, #tpu.memory_space<vmem>>) target_semaphore(%arg14 : memref<!tpu.dma_semaphore, #tpu.memory_space<semaphore_mem>>)
    %c0 = arith.constant 0 : index
    %c0_0 = arith.constant 0 : index
    %0 = vector.load %arg1[%c0, %c0_0] : memref<32x128xbf16, #tpu.memory_space<vmem>>, vector<32x128xbf16>
    %1 = tpu.iota {dimensions = array<i32: 0>} : vector<32x1xi32>
    %c32_i32 = arith.constant 32 : i32
    %2 = vector.broadcast %c32_i32 : i32 to vector<32x1xi32>
    %3 = arith.cmpi slt, %1, %2 : vector<32x1xi32>
    %c0_1 = arith.constant 0 : index
    %c0_2 = arith.constant 0 : index
    %4 = vector.load %arg2[%c0_1, %c0_2] : memref<128x128xbf16, #tpu.memory_space<vmem>>, vector<128x128xbf16>
    %cst = arith.constant dense<0.000000e+00> : vector<32x128xf32>
    %5 = tpu.matmul %0, %4, %cst {dimension_numbers = #tpu.dot_dimension_numbers<[1], [0], [0], [1], [0, 0, 1, 1], [], []>} : vector<32x128xbf16>, vector<128x128xbf16>, vector<32x128xf32> -> vector<32x128xf32>
    tpu.wait_dma2 semaphore(%arg14 : memref<!tpu.dma_semaphore, #tpu.memory_space<semaphore_mem>>) src(%arg0 : memref<32x32xbf16, #tpu.memory_space<any>>) dst(%arg13 : memref<32x32xbf16, #tpu.memory_space<vmem>>)
    %c0_3 = arith.constant 0 : index
    %c0_4 = arith.constant 0 : index
    %6 = vector.load %arg13[%c0_3, %c0_4] : memref<32x32xbf16, #tpu.memory_space<vmem>>, vector<32x32xbf16>
    %7 = arith.truncf %5 : vector<32x128xf32> to vector<32x128xbf16>
    %cst_5 = arith.constant dense<0.000000e+00> : vector<32x128xf32>
    %8 = tpu.matmul %6, %7, %cst_5 {dimension_numbers = #tpu.dot_dimension_numbers<[1], [0], [0], [1], [0, 0, 1, 1], [], []>} : vector<32x32xbf16>, vector<32x128xbf16>, vector<32x128xf32> -> vector<32x128xf32>
    %c0_6 = arith.constant 0 : index
    %c0_7 = arith.constant 0 : index
    %9 = vector.load %arg3[%c0_6, %c0_7] : memref<1x128xf32, #tpu.memory_space<vmem>>, vector<1x128xf32>
    %10 = vector.broadcast %9 : vector<1x128xf32> to vector<32x128xf32>
    %11 = arith.addf %8, %10 : vector<32x128xf32>
    %cst_8 = arith.constant 0.000000e+00 : f32
    %12 = vector.shape_cast %3 : vector<32x1xi1> to vector<32x1xi1>
    %13 = vector.broadcast %12 : vector<32x1xi1> to vector<32x128xi1>
    %14 = vector.broadcast %cst_8 : f32 to vector<32x128xf32>
    %15 = arith.select %13, %11, %14 : vector<32x128xi1>, vector<32x128xf32>
    %16 = vector.shape_cast %15 : vector<32x128xf32> to vector<1x32x128xf32>
    %cst_9 = arith.constant dense<0.000000e+00> : vector<1xf32>
    %17 = vector.multi_reduction <add>, %16, %cst_9 [1, 2] : vector<1x32x128xf32> to vector<1xf32>
    %18 = vector.shape_cast %17 : vector<1xf32> to vector<1x1x1xf32>
    %19 = vector.extract %18[0, 0, 0] : f32 from vector<1x1x1xf32>
    %cst_10 = arith.constant 1.024000e+03 : f32
    %20 = arith.divf %19, %cst_10 : f32
    %21 = arith.mulf %15, %15 : vector<32x128xf32>
    %22 = vector.shape_cast %21 : vector<32x128xf32> to vector<1x32x128xf32>
    %cst_11 = arith.constant dense<0.000000e+00> : vector<1xf32>
    %23 = vector.multi_reduction <add>, %22, %cst_11 [1, 2] : vector<1x32x128xf32> to vector<1xf32>
    %24 = vector.shape_cast %23 : vector<1xf32> to vector<1x1x1xf32>
    %25 = vector.extract %24[0, 0, 0] : f32 from vector<1x1x1xf32>
    %cst_12 = arith.constant 1.024000e+03 : f32
    %26 = arith.divf %25, %cst_12 : f32
    %27 = arith.mulf %20, %20 : f32
    %28 = arith.subf %26, %27 : f32
    %cst_13 = arith.constant 0.000000e+00 : f32
    %29 = arith.maximumf %28, %cst_13 : f32
    %30 = math.sqrt %29 : f32
    %cst_14 = arith.constant 9.99999974E-6 : f32
    %31 = arith.addf %30, %cst_14 : f32
    %cst_15 = arith.constant 1.000000e+00 : f32
    %32 = arith.divf %cst_15, %31 : f32
    %c0_16 = arith.constant 0 : index
    %c0_17 = arith.constant 0 : index
    %33 = vector.load %arg4[%c0_16, %c0_17] : memref<1x128xf32, #tpu.memory_space<vmem>>, vector<1x128xf32>
    %34 = vector.broadcast %32 : f32 to vector<1x128xf32>
    %35 = arith.mulf %33, %34 : vector<1x128xf32>
    %c0_18 = arith.constant 0 : index
    %c0_19 = arith.constant 0 : index
    %36 = vector.load %arg5[%c0_18, %c0_19] : memref<1x128xf32, #tpu.memory_space<vmem>>, vector<1x128xf32>
    %37 = vector.broadcast %20 : f32 to vector<1x128xf32>
    %38 = arith.mulf %37, %35 : vector<1x128xf32>
    %39 = arith.subf %36, %38 : vector<1x128xf32>
    %40 = vector.broadcast %35 : vector<1x128xf32> to vector<32x128xf32>
    %41 = arith.mulf %11, %40 : vector<32x128xf32>
    %42 = vector.broadcast %39 : vector<1x128xf32> to vector<32x128xf32>
    %43 = arith.addf %41, %42 : vector<32x128xf32>
    %c0_20 = arith.constant 0 : index
    %44 = memref.load %arg6[%c0_20] : memref<1xf32, #tpu.memory_space<smem>>
    %cst_21 = arith.constant 0.000000e+00 : f32
    %45 = vector.broadcast %cst_21 : f32 to vector<32x128xf32>
    %46 = arith.cmpf ogt, %43, %45 : vector<32x128xf32>
    %47 = vector.broadcast %44 : f32 to vector<32x128xf32>
    %48 = arith.mulf %43, %47 : vector<32x128xf32>
    %49 = arith.select %46, %43, %48 : vector<32x128xi1>, vector<32x128xf32>
    %50 = arith.truncf %49 : vector<32x128xf32> to vector<32x128xbf16>
    %c0_22 = arith.constant 0 : index
    %c0_23 = arith.constant 0 : index
    %51 = vector.load %arg7[%c0_22, %c0_23] : memref<128x128xbf16, #tpu.memory_space<vmem>>, vector<128x128xbf16>
    %cst_24 = arith.constant dense<0.000000e+00> : vector<32x128xf32>
    %52 = tpu.matmul %50, %51, %cst_24 {dimension_numbers = #tpu.dot_dimension_numbers<[1], [0], [0], [1], [0, 0, 1, 1], [], []>} : vector<32x128xbf16>, vector<128x128xbf16>, vector<32x128xf32> -> vector<32x128xf32>
    %53 = arith.truncf %52 : vector<32x128xf32> to vector<32x128xbf16>
    %cst_25 = arith.constant dense<0.000000e+00> : vector<32x128xf32>
    %54 = tpu.matmul %6, %53, %cst_25 {dimension_numbers = #tpu.dot_dimension_numbers<[1], [0], [0], [1], [0, 0, 1, 1], [], []>} : vector<32x32xbf16>, vector<32x128xbf16>, vector<32x128xf32> -> vector<32x128xf32>
    %c0_26 = arith.constant 0 : index
    %c0_27 = arith.constant 0 : index
    %55 = vector.load %arg8[%c0_26, %c0_27] : memref<1x128xf32, #tpu.memory_space<vmem>>, vector<1x128xf32>
    %56 = vector.broadcast %55 : vector<1x128xf32> to vector<32x128xf32>
    %57 = arith.addf %54, %56 : vector<32x128xf32>
    %cst_28 = arith.constant 0.000000e+00 : f32
    %58 = vector.shape_cast %3 : vector<32x1xi1> to vector<32x1xi1>
    %59 = vector.broadcast %58 : vector<32x1xi1> to vector<32x128xi1>
    %60 = vector.broadcast %cst_28 : f32 to vector<32x128xf32>
    %61 = arith.select %59, %57, %60 : vector<32x128xi1>, vector<32x128xf32>
    %62 = vector.shape_cast %61 : vector<32x128xf32> to vector<1x32x128xf32>
    %cst_29 = arith.constant dense<0.000000e+00> : vector<1xf32>
    %63 = vector.multi_reduction <add>, %62, %cst_29 [1, 2] : vector<1x32x128xf32> to vector<1xf32>
    %64 = vector.shape_cast %63 : vector<1xf32> to vector<1x1x1xf32>
    %65 = vector.extract %64[0, 0, 0] : f32 from vector<1x1x1xf32>
    %cst_30 = arith.constant 1.024000e+03 : f32
    %66 = arith.divf %65, %cst_30 : f32
    %67 = arith.mulf %61, %61 : vector<32x128xf32>
    %68 = vector.shape_cast %67 : vector<32x128xf32> to vector<1x32x128xf32>
    %cst_31 = arith.constant dense<0.000000e+00> : vector<1xf32>
    %69 = vector.multi_reduction <add>, %68, %cst_31 [1, 2] : vector<1x32x128xf32> to vector<1xf32>
    %70 = vector.shape_cast %69 : vector<1xf32> to vector<1x1x1xf32>
    %71 = vector.extract %70[0, 0, 0] : f32 from vector<1x1x1xf32>
    %cst_32 = arith.constant 1.024000e+03 : f32
    %72 = arith.divf %71, %cst_32 : f32
    %73 = arith.mulf %66, %66 : f32
    %74 = arith.subf %72, %73 : f32
    %cst_33 = arith.constant 0.000000e+00 : f32
    %75 = arith.maximumf %74, %cst_33 : f32
    %76 = math.sqrt %75 : f32
    %cst_34 = arith.constant 9.99999974E-6 : f32
    %77 = arith.addf %76, %cst_34 : f32
    %cst_35 = arith.constant 1.000000e+00 : f32
    %78 = arith.divf %cst_35, %77 : f32
    %c0_36 = arith.constant 0 : index
    %c0_37 = arith.constant 0 : index
    %79 = vector.load %arg9[%c0_36, %c0_37] : memref<1x128xf32, #tpu.memory_space<vmem>>, vector<1x128xf32>
    %80 = vector.broadcast %78 : f32 to vector<1x128xf32>
    %81 = arith.mulf %79, %80 : vector<1x128xf32>
    %c0_38 = arith.constant 0 : index
    %c0_39 = arith.constant 0 : index
    %82 = vector.load %arg10[%c0_38, %c0_39] : memref<1x128xf32, #tpu.memory_space<vmem>>, vector<1x128xf32>
    %83 = vector.broadcast %66 : f32 to vector<1x128xf32>
    %84 = arith.mulf %83, %81 : vector<1x128xf32>
    %85 = arith.subf %82, %84 : vector<1x128xf32>
    %86 = vector.broadcast %81 : vector<1x128xf32> to vector<32x128xf32>
    %87 = arith.mulf %57, %86 : vector<32x128xf32>
    %88 = vector.broadcast %85 : vector<1x128xf32> to vector<32x128xf32>
    %89 = arith.addf %87, %88 : vector<32x128xf32>
    %c0_40 = arith.constant 0 : index
    %90 = memref.load %arg11[%c0_40] : memref<1xf32, #tpu.memory_space<smem>>
    %cst_41 = arith.constant 0.000000e+00 : f32
    %91 = vector.broadcast %cst_41 : f32 to vector<32x128xf32>
    %92 = arith.cmpf ogt, %89, %91 : vector<32x128xf32>
    %93 = vector.broadcast %90 : f32 to vector<32x128xf32>
    %94 = arith.mulf %89, %93 : vector<32x128xf32>
    %95 = arith.select %92, %89, %94 : vector<32x128xi1>, vector<32x128xf32>
    %c0_42 = arith.constant 0 : index
    %c0_43 = arith.constant 0 : index
    %96 = vector.load %arg12[%c0_42, %c0_43] : memref<32x128xf32, #tpu.memory_space<vmem>>, vector<32x128xf32>
    tpu.vector_store %arg12[%c0_42, %c0_43], %95 {strides = array<i32>} : memref<32x128xf32, #tpu.memory_space<vmem>>, vector<32x128xf32>,
    return
  }
}

</mosaic_0001>

<bundles_post_ra>
// kernel: gcn_forward.1
= control target key start
LH: loop header
LB: loop body
LE: loop exit
PB: predicated region body
PF: predicated region fallthrough
CT: control target
= control target key end

     0   :  { %19 = vsyncpa [#allocation7], 0  ;;  %s1110_s0 = inlined_call_operand.vmem [shape: bf16[32,32], index: 0, kind: input, shape index: {}]   ;;  %s1111_s1 = inlined_call_operand.vmem [shape: bf16[32,128], index: 1, kind: input, shape index: {}]   ;;  %s1112_s2 = inlined_call_operand.vmem [shape: bf16[128,128], index: 2, kind: input, shape index: {}]   ;;  %s1113_s3 = inlined_call_operand.vmem [shape: f32[1,128], index: 3, kind: input, shape index: {}]   ;;  %s1114_s4 = inlined_call_operand.vmem [shape: f32[1,128], index: 4, kind: input, shape index: {}]   ;;  %s1115_s5 = inlined_call_operand.vmem [shape: f32[1,128], index: 5, kind: input, shape index: {}]   ;;  %s1116_s6 = inlined_call_operand.<no memory space> [shape: f32[1], index: 6, kind: input, shape index: {}]   ;;  %s1117_s7 = inlined_call_operand.vmem [shape: bf16[128,128], index: 7, kind: input, shape index: {}]   ;;  %s1118_s8 = inlined_call_operand.vmem [shape: f32[1,128], index: 8, kind: input, shape index: {}]   ;;  %s1119_s9 = inlined_call_operand.vmem [shape: f32[1,128], index: 9, kind: input, shape index: {}]   ;;  %s1120_s10 = inlined_call_operand.vmem [shape: f32[1,128], index: 10, kind: input, shape index: {}]   ;;  %s1121_s11 = inlined_call_operand.<no memory space> [shape: f32[1], index: 11, kind: input, shape index: {}]   ;;  %s1122_s12 = inlined_call_operand.hbm [shape: f32[32,128], index: 12, kind: output, shape index: {}]  }
   0x1   :  { %v75_v0 = vld [vmem:[%s1110_s0] sm:$0xff]  ;;  %v957_v1 = vld [vmem:[%s1110_s0 + $0x8] sm:$0xff] }
   0x2   :  { %86 = vsyncadd [#allocation3], 256  ;;  %v830_v2 = vld [vmem:[%s1112_s2] sm:$0xff]   ;;  %v831_v3 = vld [vmem:[%s1112_s2 + $0x8] sm:$0xff]   ;;  %vm240_vm0 = vcmask 261120  }
   0x3   :  { %754 = vmatprep.subr.bf16.mxu0 %v830_v2  ;;  %v832_v4 = vld [vmem:[%s1112_s2 + $0x10] sm:$0xff]   ;;  %v833_v5 = vld [vmem:[%s1112_s2 + $0x18] sm:$0xff]   ;;  %v838_v6 = vld [vmem:[%s1111_s1] sm:$0xff]  }
   0x4   :  { %755 = vmatpush3.bf16.msra.mxu0 %v830_v2  ;;  %770 = vmatprep.mubr.bf16.mxu0 %v838_v6  ;;  %v834_v7 = vld [vmem:[%s1112_s2 + $0x20] sm:$0xff]   ;;  %v835_v8 = vld [vmem:[%s1112_s2 + $0x28] sm:$0xff]   ;;  %v836_v9 = vld [vmem:[%s1112_s2 + $0x30] sm:$0xff]  }
   0x5   :  { %756 = vmatprep.subr.bf16.mxu0 %v831_v3  ;;  %v837_v10 = vld [vmem:[%s1112_s2 + $0x38] sm:$0xff]   ;;  %v839_v11 = vld [vmem:[%s1111_s1 + $0x8] sm:$0xff]  }
   0x8   :  { %757 = vmatpush3.bf16.msra.mxu0 %v831_v3 }
   0x9   :  { %758 = vmatprep.subr.bf16.mxu0 %v832_v4 }
   0xc   :  { %759 = vmatpush3.bf16.msra.mxu0 %v832_v4 }
   0xd   :  { %760 = vmatprep.subr.bf16.mxu0 %v833_v5 }
  0x10   :  { %761 = vmatpush3.bf16.msra.mxu0 %v833_v5 }
  0x11   :  { %762 = vmatprep.subr.bf16.mxu0 %v834_v7 }
  0x14   :  { %763 = vmatpush3.bf16.msra.mxu0 %v834_v7 }
  0x15   :  { %764 = vmatprep.subr.bf16.mxu0 %v835_v8 }
  0x18   :  { %765 = vmatpush3.bf16.msra.mxu0 %v835_v8 }
  0x19   :  { %766 = vmatprep.subr.bf16.mxu0 %v836_v9 }
  0x1c   :  { %767 = vmatpush3.bf16.msra.mxu0 %v836_v9 }
  0x1d   :  { %768 = vmatprep.subr.bf16.mxu0 %v837_v10 }
  0x20   :  { %769 = vmatpush3.bf16.msra.mxu0 %v837_v10 }
  0x23   :  { %771 = vmatmul.mubr.bf16.vlgmr.msra.gmra.mrb[0].mxu0 %v839_v11 }
  0xf6   :  { %v772_v12 = vpop.f32.mrb[0].mxu0 }
  0xf7   :  { %v210_v13 = vpop.f32.mrb[1].mxu0 }
  0xf8   :  { %v773_v14 = vpop.f32.mrb[2].mxu0 }
  0xf9   :  { %v213_v15 = vpop.f32.mrb[3].mxu0  ;;  %v232_v17 = vpack.c.bf16 %v773_v14, %v772_v12 }
  0xfa   :  { %v231_v16 = vpack.c.bf16 %v213_v15, %v210_v13 }
  0xfb   :  { %878 = dma.done.wait [#allocation3], 256 }
  0xfc   :  { %879 = vsyncadd [#allocation3], 4294967040  ;;  %778 = vmatprep.mubr.msk.bf16.mxu1 %vm240_vm0, %v75_v0  ;;  %806 = vmatprep.mubr.msk.bf16.mxu0 %vm240_vm0, %v75_v0  ;;  %v711_v18 = vld [vmem:[%s1113_s3] ss:$0 sm:$0xff]  ;;  %v841_v52 = vld [vmem:[%s1117_s7 + $0x8] sm:$0xff]   ;;  %s882_s20 = smov 0.0   ;;  %v366_v4 = vlaneseq }
  0xfd   :  { %774 = vmatprep.subr.bf16.mxu1 %v231_v16  ;;  %v840_v51 = vld [vmem:[%s1117_s7] sm:$0xff]   ;;  %v842_v53 = vld [vmem:[%s1117_s7 + $0x10] sm:$0xff]   ;;  %v843_v54 = vld [vmem:[%s1117_s7 + $0x18] sm:$0xff]  }
  0xfe   :  { %775 = vmatpush3.bf16.msra.mxu1 %v231_v16  ;;  %v844_v56 = vld [vmem:[%s1117_s7 + $0x20] sm:$0xff]   ;;  %v845_v57 = vld [vmem:[%s1117_s7 + $0x28] sm:$0xff]   ;;  %v846_v58 = vld [vmem:[%s1117_s7 + $0x30] sm:$0xff]   ;;  %v367_v5 = vshrl.u32 %v366_v4, 7 }
  0xff   :  { %776 = vmatprep.subr.bf16.mxu1 %v232_v17  ;;  %v847_v59 = vld [vmem:[%s1117_s7 + $0x38] sm:$0xff]   ;;  %v358_v6 = vld [vmem:[%s1114_s4] sm:$0x1] }
 0x100   :  { %v1048_v7 = vsub.s32 0, %v367_v5  ;;  %v361_v11 = vld [vmem:[%s1115_s5] sm:$0x1] }
 0x102   :  { %777 = vmatpush3.bf16.msra.mxu1 %v232_v17 }
 0x103   :  { %782 = vmatprep.subr.bf16.mxu1 %v840_v51 }
 0x105   :  { %779 = vmatmul.mubr.msk.bf16.vlgmr.msra.gmra.mrb[0].mxu1 %vm240_vm0, %v957_v1 }
 0x106   :  { %783 = vmatpush3.bf16.msra.mxu1 %v840_v51 }
 0x107   :  { %784 = vmatprep.subr.bf16.mxu1 %v841_v52 }
 0x10a   :  { %785 = vmatpush3.bf16.msra.mxu1 %v841_v52 }
 0x10b   :  { %786 = vmatprep.subr.bf16.mxu1 %v842_v53 }
 0x10e   :  { %787 = vmatpush3.bf16.msra.mxu1 %v842_v53 }
 0x10f   :  { %788 = vmatprep.subr.bf16.mxu1 %v843_v54 }
 0x112   :  { %789 = vmatpush3.bf16.msra.mxu1 %v843_v54 }
 0x113   :  { %790 = vmatprep.subr.bf16.mxu1 %v844_v56 }
 0x116   :  { %791 = vmatpush3.bf16.msra.mxu1 %v844_v56 }
 0x117   :  { %792 = vmatprep.subr.bf16.mxu1 %v845_v57 }
 0x11a   :  { %793 = vmatpush3.bf16.msra.mxu1 %v845_v57 }
 0x11b   :  { %794 = vmatprep.subr.bf16.mxu1 %v846_v58 }
 0x11e   :  { %795 = vmatpush3.bf16.msra.mxu1 %v846_v58 }
 0x11f   :  { %796 = vmatprep.subr.bf16.mxu1 %v847_v59 }
 0x122   :  { %797 = vmatpush3.bf16.msra.mxu1 %v847_v59 }
 0x1d8   :  { %v780_v19 = vpop.f32.mrb[0].mxu1 }
 0x1d9   :  { %v281_v20 = vpop.f32.mrb[1].mxu1  ;;  %v998_v24 = vadd.f32 %v780_v19, %v711_v18 }
 0x1da   :  { %v996_v21 = vadd.f32 %v711_v18, %v281_v20  ;;  %v781_v22 = vpop.f32.mrb[2].mxu1  ;;  %v390_v20 = vstv %s1116_s6 }
 0x1db   :  { %v284_v23 = vpop.f32.mrb[3].mxu1  ;;  %v325_v29 = vmul.f32 %v998_v24, %v998_v24  ;;  %v1010_v30 = vadd.f32 %v781_v22, %v711_v18 }
 0x1dc   :  { %v1000_v25 = vadd.f32 %v711_v18, %v284_v23  ;;  %v323_v26 = vmul.f32 %v996_v21, %v996_v21 }
 0x1dd   :  { %v326_v35 = vmul.f32 %v1010_v30, %v1010_v30 }
 0x1de   :  { %v324_v27 = vmul.f32 %v1000_v25, %v1000_v25  ;;  %v308_v28 = vadd.f32 %v1000_v25, %v996_v21 }
 0x1e0   :  { %v309_v31 = vadd.f32 %v308_v28, %v998_v24  ;;  %v327_v32 = vadd.f32 %v324_v27, %v323_v26 }
 0x1e2   :  { %v310_v33 = vadd.f32 %v309_v31, %v1010_v30  ;;  %v328_v34 = vadd.f32 %v327_v32, %v325_v29 }
 0x1e4   :  { %311 = vadd.xlane.f32.xlu0 %v310_v33  ;;  %v329_v36 = vadd.f32 %v328_v34, %v326_v35 }
 0x1e8   :  { %330 = vadd.xlane.f32.xlu0 %v329_v36 }
 0x271   :  { %v312_v37 = vpop.xlane.xlu0 %311 }
 0x272   :  { %v313_v38 = vrot.slane %v312_v37, 4 }
 0x274   :  { %v314_v39 = vadd.f32 %v313_v38, %v312_v37 }
 0x275   :  { %v331_v40 = vpop.xlane.xlu0 %330 }
 0x276   :  { %v315_v41 = vrot.slane %v314_v39, 2  ;;  %v332_v42 = vrot.slane %v331_v40, 4 }
 0x278   :  { %v333_v43 = vadd.f32 %v332_v42, %v331_v40  ;;  %v316_v44 = vadd.f32 %v315_v41, %v314_v39  ;;  %v722_v41 = vld [vmem:[%s1118_s8] ss:$0 sm:$0xff] }
 0x27a   :  { %v334_v45 = vrot.slane %v333_v43, 2  ;;  %v317_v46 = vrot.slane %v316_v44, 1 }
 0x27c   :  { %v335_v47 = vadd.f32 %v334_v45, %v333_v43  ;;  %v318_v48 = vadd.f32 %v317_v46, %v316_v44 }
 0x27e   :  { %810 = vpush %v318_v48  ;;  %v336_v49 = vrot.slane %v335_v47, 1 }
 0x280   :  { %v337_v50 = vadd.f32 %v336_v49, %v335_v47 }
 0x282   :  { %812 = vpush %v337_v50 }
 0x2af   :  { %s811_s14 = spop %810 }
 0x2b0   :  { %s1028_s15 = smul.f32 0.0009765625, %s811_s14 }
 0x2b2   :  { %s342_s16 = smul.f32 %s1028_s15, %s1028_s15  ;;  %v362_v10 = vstv %s1028_s15 }
 0x2b3   :  { %s813_s17 = spop %812 }
 0x2b4   :  { %s341_s18 = smul.f32 0.0009765625, %s813_s17 }
 0x2b6   :  { %s343_s19 = ssub.f32 %s341_s18, %s342_s16 }
 0x2b8   :  { %s344_s21 = smax.f32 %s882_s20, %s343_s19 }
 0x2b9   :  { %v345_v55 = vstv %s344_s21 }
 0x2ba   :  { %848 = vrsqrt.f32 %v345_v55  ;;  %vm348_vm1 = vcmp.eq.f32.partialorder %v345_v55, inf  ;;  %v351_v62 = vand.u32 2147483648, %v345_v55  ;;  %vm350_vm2 = vcmp.eq.f32.partialorder %v345_v55, 0.0 }
 0x2c4   :  { %v849_v60 = vpop.eup %848 }
 0x2c5   :  { %v347_v61 = vmul.f32 %v849_v60, %v345_v55 }
 0x2c7   :  { %v349_v63 = vsel %vm348_vm1, %v345_v55, %v347_v61 }
 0x2c8   :  { %v352_v0 = vsel %vm350_vm2, %v351_v62, %v349_v63 }
 0x2c9   :  { %814 = vpush %v352_v0 }
 0x2fa   :  { %s815_s27 = spop %814 }
 0x2fb   :  { %s354_s28 = sadd.f32 1e-05, %s815_s27 }
 0x2fd   :  { %v355_v2 = vstv %s354_s28 }
 0x2fe   :  { %850 = vrcp.f32 %v355_v2 }
 0x308   :  { %v851_v3 = vpop.eup %850 }
 0x309   :  { %816 = vpush %v851_v3 }
 0x33a   :  { %s817_s30 = spop %816 }
 0x33b   :  { %v359_v8 = vstv %s817_s30 }
 0x33c   :  { %v360_v9 = vmul.f32 %v359_v8, %v358_v6 }
 0x33e   :  { %v363_v12 = vmul.f32 %v362_v10, %v360_v9  ;;  %v369_v13 = vrot.slane %v360_v9, %v1048_v7 }
 0x340   :  { %v364_v14 = vsub.f32 %v361_v11, %v363_v12  ;;  %v373_v15 = vmul.f32 %v369_v13, %v998_v24  ;;  %v374_v16 = vmul.f32 %v369_v13, %v1010_v30  ;;  %v371_v18 = vmul.f32 %v369_v13, %v996_v21 }
 0x341   :  { %v372_v19 = vmul.f32 %v369_v13, %v1000_v25 }
 0x342   :  { %v379_v17 = vrot.slane %v364_v14, %v1048_v7 }
 0x344   :  { %v381_v22 = vadd.f32 %v379_v17, %v371_v18  ;;  %v382_v23 = vadd.f32 %v379_v17, %v372_v19  ;;  %v383_v26 = vadd.f32 %v379_v17, %v373_v15  ;;  %v384_v27 = vadd.f32 %v379_v17, %v374_v16  ;;  %v626_v19 = vld [vmem:[%s1119_s9] sm:$0x1] }
 0x346   :  { %vm386_vm3 = vcmp.gt.f32.partialorder %v381_v22, 0.0  ;;  %vm387_vm4 = vcmp.gt.f32.partialorder %v382_v23, 0.0  ;;  %v391_v28 = vmul.f32 %v390_v20, %v381_v22  ;;  %v392_v24 = vmul.f32 %v390_v20, %v382_v23 }
 0x347   :  { %vm388_vm5 = vcmp.gt.f32.partialorder %v383_v26, 0.0  ;;  %vm389_vm6 = vcmp.gt.f32.partialorder %v384_v27, 0.0  ;;  %v393_v29 = vmul.f32 %v390_v20, %v383_v26  ;;  %v394_v30 = vmul.f32 %v390_v20, %v384_v27 }
 0x348   :  { %v395_v31 = vsel %vm386_vm3, %v381_v22, %v391_v28  ;;  %v396_v21 = vsel %vm387_vm4, %v382_v23, %v392_v24 }
 0x349   :  { %v399_v32 = vpack.c.bf16 %v396_v21, %v395_v31  ;;  %v397_v25 = vsel %vm388_vm5, %v383_v26, %v393_v29  ;;  %v398_v33 = vsel %vm389_vm6, %v384_v27, %v394_v30  ;;  %v629_v26 = vld [vmem:[%s1120_s10] sm:$0x1]  ;;  %s883_s10 = smov [#allocation6]  }
 0x34a   :  { %v400_v34 = vpack.c.bf16 %v398_v33, %v397_v25  ;;  %v658_v25 = vstv %s1121_s11  ;;  %s676_s26 = sshll.u32 %s883_s10, 4  ;;  %s677_s26 = int_to_ptr.vmem [resolvable:$true] %s676_s26 }
 0x34b   :  { %798 = vmatprep.mubr.bf16.mxu1 %v399_v32  ;;  %s856_s11 = scalar_lea.vmem %s677_s26, 512  ;;  %p861_p1 = scmp.lt.s32.totalorder %s677_s26, %s677_s26 }
 0x34c   :  { %799 = vmatmul.mubr.bf16.vlgmr.msra.gmra.mrb[4].mxu1 %v400_v34  ;;  %p857_p0 = scmp.ne.s32.totalorder %s677_s26, %s856_s11  ;;  %p862_p2 = scmp.lt.s32.totalorder %s856_s11, %s856_s11 }
 0x34e   :  { %p863_p3 = por %p862_p2, %p861_p1 }
 0x350   :  { %p864_p4 = pnand %p863_p3, %p857_p0 }
 0x41f   :  { %v800_v35 = vpop.f32.mrb[4].mxu1 }
 0x420   :  { %v499_v36 = vpop.f32.mrb[5].mxu1 }
 0x421   :  { %v801_v37 = vpop.f32.mrb[6].mxu1 }
 0x422   :  { %v515_v38 = vpack.c.bf16 %v801_v37, %v800_v35  ;;  %v502_v39 = vpop.f32.mrb[7].mxu1 }
 0x423   :  { %v514_v40 = vpack.c.bf16 %v502_v39, %v499_v36 }
 0x425   :  { %802 = vmatprep.subr.bf16.mxu0 %v514_v40 }
 0x426   :  { %803 = vmatpush3.bf16.msra.mxu0 %v514_v40 }
 0x427   :  { %804 = vmatprep.subr.bf16.mxu0 %v515_v38 }
 0x42a   :  { %805 = vmatpush3.bf16.msra.mxu0 %v515_v38 }
 0x42d   :  { %807 = vmatmul.mubr.msk.bf16.vlgmr.msra.gmra.mrb[4].mxu0 %vm240_vm0, %v957_v1 }
 0x500   :  { %v808_v42 = vpop.f32.mrb[4].mxu0 }
 0x501   :  { %v557_v43 = vpop.f32.mrb[5].mxu0  ;;  %v1070_v47 = vadd.f32 %v808_v42, %v722_v41 }
 0x502   :  { %v1068_v44 = vadd.f32 %v722_v41, %v557_v43  ;;  %v809_v45 = vpop.f32.mrb[6].mxu0 }
 0x503   :  { %v560_v46 = vpop.f32.mrb[7].mxu0  ;;  %v593_v51 = vmul.f32 %v1070_v47, %v1070_v47  ;;  %v569_v52 = vadd.f32 %v809_v45, %v722_v41 }
 0x504   :  { %v1072_v48 = vadd.f32 %v722_v41, %v560_v46  ;;  %v591_v49 = vmul.f32 %v1068_v44, %v1068_v44 }
 0x505   :  { %v594_v57 = vmul.f32 %v569_v52, %v569_v52 }
 0x506   :  { %v592_v1 = vmul.f32 %v1072_v48, %v1072_v48  ;;  %v576_v50 = vadd.f32 %v1072_v48, %v1068_v44 }
 0x508   :  { %v577_v53 = vadd.f32 %v576_v50, %v1070_v47  ;;  %v595_v54 = vadd.f32 %v592_v1, %v591_v49 }
 0x50a   :  { %v578_v55 = vadd.f32 %v577_v53, %v569_v52  ;;  %v596_v56 = vadd.f32 %v595_v54, %v593_v51 }
 0x50c   :  { %579 = vadd.xlane.f32.xlu1 %v578_v55  ;;  %v597_v58 = vadd.f32 %v596_v56, %v594_v57 }
 0x510   :  { %598 = vadd.xlane.f32.xlu1 %v597_v58 }
 0x599   :  { %v580_v59 = vpop.xlane.xlu1 %579 }
 0x59a   :  { %v581_v60 = vrot.slane %v580_v59, 4 }
 0x59c   :  { %v582_v61 = vadd.f32 %v581_v60, %v580_v59 }
 0x59d   :  { %v599_v62 = vpop.xlane.xlu1 %598 }
 0x59e   :  { %v583_v63 = vrot.slane %v582_v61, 2  ;;  %v600_v0 = vrot.slane %v599_v62, 4 }
 0x5a0   :  { %v601_v2 = vadd.f32 %v600_v0, %v599_v62  ;;  %v584_v3 = vadd.f32 %v583_v63, %v582_v61 }
 0x5a2   :  { %v602_v4 = vrot.slane %v601_v2, 2  ;;  %v585_v5 = vrot.slane %v584_v3, 1 }
 0x5a4   :  { %v603_v6 = vadd.f32 %v602_v4, %v601_v2  ;;  %v586_v8 = vadd.f32 %v585_v5, %v584_v3 }
 0x5a6   :  { %818 = vpush %v586_v8  ;;  %v604_v9 = vrot.slane %v603_v6, 1 }
 0x5a8   :  { %v605_v10 = vadd.f32 %v604_v9, %v603_v6 }
 0x5aa   :  { %820 = vpush %v605_v10 }
 0x5d7   :  { %s819_s8 = spop %818 }
 0x5d8   :  { %s590_s15 = smul.f32 0.0009765625, %s819_s8 }
 0x5da   :  { %s610_s16 = smul.f32 %s590_s15, %s590_s15  ;;  %v630_v23 = vstv %s590_s15 }
 0x5db   :  { %s821_s17 = spop %820 }
 0x5dc   :  { %s609_s18 = smul.f32 0.0009765625, %s821_s17 }
 0x5de   :  { %s611_s19 = ssub.f32 %s609_s18, %s610_s16 }
 0x5e0   :  { %s612_s21 = smax.f32 %s882_s20, %s611_s19 }
 0x5e1   :  { %v613_v11 = vstv %s612_s21 }
 0x5e2   :  { %852 = vrsqrt.f32 %v613_v11  ;;  %vm616_vm7 = vcmp.eq.f32.partialorder %v613_v11, inf  ;;  %v619_v14 = vand.u32 2147483648, %v613_v11  ;;  %vm618_vm8 = vcmp.eq.f32.partialorder %v613_v11, 0.0 }
 0x5ec   :  { %v853_v12 = vpop.eup %852 }
 0x5ed   :  { %v615_v13 = vmul.f32 %v853_v12, %v613_v11 }
 0x5ef   :  { %v617_v15 = vsel %vm616_vm7, %v613_v11, %v615_v13 }
 0x5f0   :  { %v620_v16 = vsel %vm618_vm8, %v619_v14, %v617_v15 }
 0x5f1   :  { %822 = vpush %v620_v16 }
 0x622   :  { %s823_s22 = spop %822 }
 0x623   :  { %s622_s23 = sadd.f32 1e-05, %s823_s22 }
 0x625   :  { %v623_v17 = vstv %s622_s23 }
 0x626   :  { %854 = vrcp.f32 %v623_v17 }
 0x630   :  { %v855_v18 = vpop.eup %854 }
 0x631   :  { %824 = vpush %v855_v18 }
 0x662   :  { %s825_s20 = spop %824 }
 0x663   :  { %v627_v20 = vstv %s825_s20 }
 0x664   :  { %v628_v22 = vmul.f32 %v627_v20, %v626_v19 }
 0x666   :  { %v631_v27 = vmul.f32 %v630_v23, %v628_v22  ;;  %v637_v28 = vrot.slane %v628_v22, %v1048_v7 }
 0x668   :  { %v632_v24 = vsub.f32 %v629_v26, %v631_v27  ;;  %v639_v29 = vmul.f32 %v637_v28, %v1068_v44  ;;  %v640_v30 = vmul.f32 %v637_v28, %v1072_v48  ;;  %v641_v31 = vmul.f32 %v637_v28, %v1070_v47 }
 0x669   :  { %v642_v21 = vmul.f32 %v637_v28, %v569_v52 }
 0x66a   :  { %v647_v32 = vrot.slane %v632_v24, %v1048_v7 }
 0x66c   :  { %v649_v33 = vadd.f32 %v647_v32, %v639_v29  ;;  %v650_v34 = vadd.f32 %v647_v32, %v640_v30  ;;  %v651_v35 = vadd.f32 %v647_v32, %v641_v31  ;;  %v652_v36 = vadd.f32 %v647_v32, %v642_v21 }
 0x66e   :  { %vm654_vm9 = vcmp.gt.f32.partialorder %v649_v33, 0.0  ;;  %vm655_vm10 = vcmp.gt.f32.partialorder %v650_v34, 0.0  ;;  %vm656_vm11 = vcmp.gt.f32.partialorder %v651_v35, 0.0  ;;  %vm657_vm12 = vcmp.gt.f32.partialorder %v652_v36, 0.0 }
 0x66f   :  { %v659_v37 = vmul.f32 %v658_v25, %v649_v33  ;;  %v660_v38 = vmul.f32 %v658_v25, %v650_v34  ;;  %v661_v39 = vmul.f32 %v658_v25, %v651_v35  ;;  %v662_v40 = vmul.f32 %v658_v25, %v652_v36 }
 0x671   :  { %v663_v7 = vsel %vm654_vm9, %v649_v33, %v659_v37  ;;  %v664_v41 = vsel %vm655_vm10, %v650_v34, %v660_v38  ;;  %v665_v42 = vsel %vm656_vm11, %v651_v35, %v661_v39  ;;  %v666_v43 = vsel %vm657_vm12, %v652_v36, %v662_v40 }
 0x672   :  { %667 = vst [vmem:[#allocation6] sm:$0xff] %v663_v7  ;;  %668 = vst [vmem:[#allocation6 + $0x8] sm:$0xff] %v664_v41 }
 0x673   :  { %669 = vst [vmem:[#allocation6 + $0x10] sm:$0xff] %v665_v42  ;;  %670 = vst [vmem:[#allocation6 + $0x18] sm:$0xff] %v666_v43 }
 0x674   :  { %867 = shalt.err (!%p864_p4)
}
 0x675   :  { %s868_s7 = scalar_lea.hbm %s1122_s12, 512 }
 0x676   :  { %p869_p5 = scmp.ne.s32.totalorder %s1122_s12, %s868_s7  ;;  %p872_p6 = scmp.lt.u32.totalorder %s868_s7, %s1122_s12 }
 0x678   :  { %p874_p7 = pnand %p872_p6, %p869_p5 }
 0x67a   :  { %877 = shalt.err (!%p874_p7)
}
 0x67b   :  { %s884_s4 = smov 128   ;;  %s885_s14 = smov 8  }
 0x67c   :  { %682 = dma.vmem_to_hbm [thread:$0]  %s677_s26, 512, %s1122_s12, [#allocation7], %s884_s4, %s884_s4, %s885_s14  }
 0x67d   :  { %880 = dma.done.wait [#allocation7], 512  }
 0x67e   :  { %881 = vsyncadd [#allocation7], 4294966784 }
 0x67f   :  { %686 = vsyncpa [#allocation7], 1 }
 0x680   :  { %687 = vsyncmov [#allocation3] }
 0x683   :  { %s688_s8 = vpop.sfrf %687 }
 0x684   :  { %p725_p8 = scmp.ne.s32.totalorder %s688_s8, 0 }
 0x686   :  { %692 = shalt.err (%p725_p8)  }

</bundles_post_ra>
